<compile_context>
chip_gen: v7x
topology: tpu7x:2x2x1
jax: 0.10.0
libtpu: 0.0.40
codegen_flags: <defaults>
</compile_context>

<pallas_src>
import functools

import jax
import jax.numpy as jnp
from jax.experimental import pallas as pl
from jax.experimental.pallas import tpu as pltpu

# Layer sizes from the PyTorch module.
D_IN, D_H1, D_H2, D_LAT = 28 * 28, 64, 12, 3
# Lane-dense padded sizes (multiples of 128) for the HBM-facing arrays.
F_PAD = 896     # 784 -> 7 * 128
LAT_PAD = 128   # 3   -> 128


def _round_up(n, m):
    return ((n + m - 1) // m) * m


def _ae_kernel(x_ref,
               w1, b1, w2, b2, w3, b3,      # encoder params (bf16 W, f32 b)
               w4, b4, w5, b5, w6, b6,      # decoder params (bf16 W, f32 b)
               enc_ref, dec_ref):
    """Fused encoder+decoder MLP for one batch tile; all matmuls on the MXU.

    Activations are re-cast to bf16 before each dot so the MXU runs native
    single-pass bf16; accumulation stays in f32 (preferred_element_type).
    """
    bf16 = jnp.bfloat16
    f32 = jnp.float32
    x = x_ref[...]                                                 # (bm, 896) bf16

    # ---- encoder: Linear -> Tanh -> Linear -> Tanh -> Linear ----
    h = jnp.tanh(jnp.dot(x, w1[...], preferred_element_type=f32) + b1[...])
    h = jnp.tanh(jnp.dot(h.astype(bf16), w2[...], preferred_element_type=f32) + b2[...])
    enc = jnp.dot(h.astype(bf16), w3[...], preferred_element_type=f32) + b3[...]
    enc_ref[...] = enc                                             # (bm, 128) f32, cols 3.. are zero-pad

    # ---- decoder: Linear -> Tanh -> Linear -> Tanh -> Linear -> Sigmoid ----
    h = jnp.tanh(jnp.dot(enc.astype(bf16), w4[...], preferred_element_type=f32) + b4[...])
    h = jnp.tanh(jnp.dot(h.astype(bf16), w5[...], preferred_element_type=f32) + b5[...])
    z = jnp.dot(h.astype(bf16), w6[...], preferred_element_type=f32) + b6[...]
    # f32 sigmoid, bf16 store (the bf16 writeback is the HBM win; a bf16-EUP
    # sigmoid would be a further v6e/v7x-only micro-opt, kept f32 for portability).
    dec_ref[...] = jax.nn.sigmoid(z).astype(dec_ref.dtype)


@functools.partial(jax.jit, static_argnames=("bm",))
def autoencoder_forward(x, params, *, bm=1024):
    """Runs the fused AE kernel.

    Returns (encoded[B,3] f32, decoded[B,784] bf16).  The batch is tiled by
    `bm` (clamped to the 16-aligned batch size) and padded to a whole number
    of tiles; feature/latent dims are padded to lane-dense widths internally.
    """
    B, F = x.shape
    assert F == D_IN

    # Adaptive batch tile: never larger than the (16-aligned) batch; pad the
    # batch up to a whole number of tiles instead of asserting divisibility.
    bm_eff = min(bm, _round_up(B, 16))
    B_pad = _round_up(B, bm_eff)

    (w1, b1), (w2, b2), (w3, b3), (w4, b4), (w5, b5), (w6, b6) = params
    bf16 = jnp.bfloat16

    # Lane-dense bf16 inputs; zero padding keeps the math identical.
    x_p = jnp.pad(x.astype(bf16), ((0, B_pad - B), (0, F_PAD - F)))
    w1_p = jnp.pad(w1, ((0, F_PAD - D_IN), (0, 0))).astype(bf16)
    w2_p = w2.astype(bf16)
    w3_p = jnp.pad(w3, ((0, 0), (0, LAT_PAD - D_LAT))).astype(bf16)
    b3_p = jnp.pad(b3, ((0, 0), (0, LAT_PAD - D_LAT)))
    w4_p = jnp.pad(w4, ((0, LAT_PAD - D_LAT), (0, 0))).astype(bf16)
    w5_p = w5.astype(bf16)
    w6_p = jnp.pad(w6, ((0, 0), (0, F_PAD - D_IN))).astype(bf16)
    b6_p = jnp.pad(b6, ((0, 0), (0, F_PAD - D_IN)))
    flat_params = (w1_p, b1, w2_p, b2, w3_p, b3_p, w4_p, b4, w5_p, b5, w6_p, b6_p)

    # x / outputs tile over the batch; every parameter is a single full-size
    # block resident in VMEM (their index_map is grid-invariant).
    in_specs = [pl.BlockSpec((bm_eff, F_PAD), lambda i: (i, 0))]
    in_specs += [pl.BlockSpec(p.shape, lambda i: (0, 0)) for p in flat_params]

    out_specs = [
        pl.BlockSpec((bm_eff, LAT_PAD), lambda i: (i, 0)),
        pl.BlockSpec((bm_eff, F_PAD), lambda i: (i, 0)),
    ]
    out_shape = (
        jax.ShapeDtypeStruct((B_pad, LAT_PAD), jnp.float32),
        jax.ShapeDtypeStruct((B_pad, F_PAD), bf16),
    )

    grid_spec = pltpu.PrefetchScalarGridSpec(
        num_scalar_prefetch=0,
        grid=(B_pad // bm_eff,),
        in_specs=in_specs,
        out_specs=out_specs,
    )

    enc_p, dec_p = pl.pallas_call(
        _ae_kernel,
        out_shape=out_shape,
        grid_spec=grid_spec,
        compiler_params=pltpu.CompilerParams(
            dimension_semantics=("parallel",),
            # Above the 16/32 MiB scoped defaults, below v7x's 64 MiB VMEM.
            vmem_limit_bytes=48 * 1024 * 1024,
        ),
    )(x_p, *flat_params)

    # Strip batch + feature padding.  dec stays bf16 (halved HBM writeback).
    return enc_p[:B, :D_LAT], dec_p[:B, :D_IN]


def init_params(key):
    """Deterministic init mimicking PyTorch nn.Linear default (U[-1/sqrt(fan_in), +])."""
    dims = [(D_IN, D_H1), (D_H1, D_H2), (D_H2, D_LAT),   # encoder
            (D_LAT, D_H2), (D_H2, D_H1), (D_H1, D_IN)]   # decoder
    params = []
    for (fan_in, fan_out) in dims:
        key, kw, kb = jax.random.split(key, 3)
        bound = 1.0 / jnp.sqrt(jnp.float32(fan_in))
        # Stored directly as (in, out) = W.T relative to PyTorch's (out, in).
        w = jax.random.uniform(kw, (fan_in, fan_out), jnp.float32, -bound, bound)
        b = jax.random.uniform(kb, (1, fan_out), jnp.float32, -bound, bound)
        params.append((w, b))
    return params


def reference_forward(x, params):
    """Pure-JAX reference using the same bf16-weight / f32-accumulate math."""
    bf16, f32 = jnp.bfloat16, jnp.float32

    def lin(h, w, b):
        return jnp.dot(h.astype(bf16), w.astype(bf16), preferred_element_type=f32) + b

    (w1, b1), (w2, b2), (w3, b3), (w4, b4), (w5, b5), (w6, b6) = params
    h = jnp.tanh(lin(x, w1, b1))
    h = jnp.tanh(lin(h, w2, b2))
    enc = lin(h, w3, b3)
    h = jnp.tanh(lin(enc, w4, b4))
    h = jnp.tanh(lin(h, w5, b5))
    dec = jax.nn.sigmoid(lin(h, w6, b6))
    return enc, dec


if __name__ == "__main__":
    key = jax.random.PRNGKey(0)
    kx, kp = jax.random.split(key)

    B = 8  # small smoke-test batch; wrapper pads/tiles transparently
    x = jax.random.normal(kx, (B, D_IN), jnp.float32)
    params = init_params(kp)

    enc, dec = autoencoder_forward(x, params)
    jax.block_until_ready((enc, dec))

    enc_ref, dec_ref = reference_forward(x, params)
    assert enc.shape == (B, D_LAT) and dec.shape == (B, D_IN)
    assert enc.dtype == jnp.float32 and dec.dtype == jnp.bfloat16
    assert jnp.allclose(enc, enc_ref, atol=1e-2, rtol=1e-2)
    assert jnp.allclose(dec.astype(jnp.float32), dec_ref, atol=1e-2, rtol=1e-2)

    print("KERNEL_OK")
</pallas_src>

<mosaic_0001>
module attributes {stable_mosaic.version = 11 : i64} {
  func.func @_ae_kernel(%arg0: i32, %arg1: memref<16x896xbf16, #tpu.memory_space<vmem>>, %arg2: memref<896x64xbf16, #tpu.memory_space<vmem>>, %arg3: memref<1x64xf32, #tpu.memory_space<vmem>>, %arg4: memref<64x12xbf16, #tpu.memory_space<vmem>>, %arg5: memref<1x12xf32, #tpu.memory_space<vmem>>, %arg6: memref<12x128xbf16, #tpu.memory_space<vmem>>, %arg7: memref<1x128xf32, #tpu.memory_space<vmem>>, %arg8: memref<128x12xbf16, #tpu.memory_space<vmem>>, %arg9: memref<1x12xf32, #tpu.memory_space<vmem>>, %arg10: memref<12x64xbf16, #tpu.memory_space<vmem>>, %arg11: memref<1x64xf32, #tpu.memory_space<vmem>>, %arg12: memref<64x896xbf16, #tpu.memory_space<vmem>>, %arg13: memref<1x896xf32, #tpu.memory_space<vmem>>, %arg14: memref<16x128xf32, #tpu.memory_space<vmem>>, %arg15: memref<16x896xbf16, #tpu.memory_space<vmem>>) attributes {dimension_semantics = [#tpu.dimension_semantics<parallel>], iteration_bounds = array<i64: 1>, scalar_prefetch = 0 : i64, scratch_operands = 0 : i64, tpu.core_type = #tpu.core_type<tc>, window_params = [{transform_indices = @transform_0, window_bounds = array<i64: 16, 896>}, {pipeline_mode = #tpu.pipeline_mode<synchronous>, transform_indices = @transform_1, window_bounds = array<i64: 896, 64>}, {pipeline_mode = #tpu.pipeline_mode<synchronous>, transform_indices = @transform_2, window_bounds = array<i64: 1, 64>}, {pipeline_mode = #tpu.pipeline_mode<synchronous>, transform_indices = @transform_3, window_bounds = array<i64: 64, 12>}, {pipeline_mode = #tpu.pipeline_mode<synchronous>, transform_indices = @transform_4, window_bounds = array<i64: 1, 12>}, {pipeline_mode = #tpu.pipeline_mode<synchronous>, transform_indices = @transform_5, window_bounds = array<i64: 12, 128>}, {pipeline_mode = #tpu.pipeline_mode<synchronous>, transform_indices = @transform_6, window_bounds = array<i64: 1, 128>}, {pipeline_mode = #tpu.pipeline_mode<synchronous>, transform_indices = @transform_7, window_bounds = array<i64: 128, 12>}, {pipeline_mode = #tpu.pipeline_mode<synchronous>, transform_indices = @transform_8, window_bounds = array<i64: 1, 12>}, {pipeline_mode = #tpu.pipeline_mode<synchronous>, transform_indices = @transform_9, window_bounds = array<i64: 12, 64>}, {pipeline_mode = #tpu.pipeline_mode<synchronous>, transform_indices = @transform_10, window_bounds = array<i64: 1, 64>}, {pipeline_mode = #tpu.pipeline_mode<synchronous>, transform_indices = @transform_11, window_bounds = array<i64: 64, 896>}, {pipeline_mode = #tpu.pipeline_mode<synchronous>, transform_indices = @transform_12, window_bounds = array<i64: 1, 896>}, {transform_indices = @transform_13, window_bounds = array<i64: 16, 128>}, {transform_indices = @transform_14, window_bounds = array<i64: 16, 896>}]} {
    %c0 = arith.constant 0 : index
    %c0_0 = arith.constant 0 : index
    %0 = vector.load %arg1[%c0, %c0_0] : memref<16x896xbf16, #tpu.memory_space<vmem>>, vector<16x896xbf16>
    %c0_1 = arith.constant 0 : index
    %c0_2 = arith.constant 0 : index
    %1 = vector.load %arg2[%c0_1, %c0_2] : memref<896x64xbf16, #tpu.memory_space<vmem>>, vector<896x64xbf16>
    %cst = arith.constant dense<0.000000e+00> : vector<16x64xf32>
    %2 = tpu.matmul %0, %1, %cst {dimension_numbers = #tpu.dot_dimension_numbers<[1], [0], [0], [1], [0, 0, 1, 1], [], []>} : vector<16x896xbf16>, vector<896x64xbf16>, vector<16x64xf32> -> vector<16x64xf32>
    %c0_3 = arith.constant 0 : index
    %c0_4 = arith.constant 0 : index
    %3 = vector.load %arg3[%c0_3, %c0_4] : memref<1x64xf32, #tpu.memory_space<vmem>>, vector<1x64xf32>
    %4 = vector.broadcast %3 : vector<1x64xf32> to vector<16x64xf32>
    %5 = arith.addf %2, %4 : vector<16x64xf32>
    %6 = math.tanh %5 : vector<16x64xf32>
    %7 = arith.truncf %6 : vector<16x64xf32> to vector<16x64xbf16>
    %c0_5 = arith.constant 0 : index
    %c0_6 = arith.constant 0 : index
    %8 = vector.load %arg4[%c0_5, %c0_6] : memref<64x12xbf16, #tpu.memory_space<vmem>>, vector<64x12xbf16>
    %cst_7 = arith.constant dense<0.000000e+00> : vector<16x12xf32>
    %9 = tpu.matmul %7, %8, %cst_7 {dimension_numbers = #tpu.dot_dimension_numbers<[1], [0], [0], [1], [0, 0, 1, 1], [], []>} : vector<16x64xbf16>, vector<64x12xbf16>, vector<16x12xf32> -> vector<16x12xf32>
    %c0_8 = arith.constant 0 : index
    %c0_9 = arith.constant 0 : index
    %10 = vector.load %arg5[%c0_8, %c0_9] : memref<1x12xf32, #tpu.memory_space<vmem>>, vector<1x12xf32>
    %11 = vector.broadcast %10 : vector<1x12xf32> to vector<16x12xf32>
    %12 = arith.addf %9, %11 : vector<16x12xf32>
    %13 = math.tanh %12 : vector<16x12xf32>
    %14 = arith.truncf %13 : vector<16x12xf32> to vector<16x12xbf16>
    %c0_10 = arith.constant 0 : index
    %c0_11 = arith.constant 0 : index
    %15 = vector.load %arg6[%c0_10, %c0_11] : memref<12x128xbf16, #tpu.memory_space<vmem>>, vector<12x128xbf16>
    %cst_12 = arith.constant dense<0.000000e+00> : vector<16x128xf32>
    %16 = tpu.matmul %14, %15, %cst_12 {dimension_numbers = #tpu.dot_dimension_numbers<[1], [0], [0], [1], [0, 0, 1, 1], [], []>} : vector<16x12xbf16>, vector<12x128xbf16>, vector<16x128xf32> -> vector<16x128xf32>
    %c0_13 = arith.constant 0 : index
    %c0_14 = arith.constant 0 : index
    %17 = vector.load %arg7[%c0_13, %c0_14] : memref<1x128xf32, #tpu.memory_space<vmem>>, vector<1x128xf32>
    %18 = vector.broadcast %17 : vector<1x128xf32> to vector<16x128xf32>
    %19 = arith.addf %16, %18 : vector<16x128xf32>
    %c0_15 = arith.constant 0 : index
    %c0_16 = arith.constant 0 : index
    %20 = vector.load %arg14[%c0_15, %c0_16] : memref<16x128xf32, #tpu.memory_space<vmem>>, vector<16x128xf32>
    tpu.vector_store %arg14[%c0_15, %c0_16], %19 {strides = array<i32>} : memref<16x128xf32, #tpu.memory_space<vmem>>, vector<16x128xf32>,
    %21 = arith.truncf %19 : vector<16x128xf32> to vector<16x128xbf16>
    %c0_17 = arith.constant 0 : index
    %c0_18 = arith.constant 0 : index
    %22 = vector.load %arg8[%c0_17, %c0_18] : memref<128x12xbf16, #tpu.memory_space<vmem>>, vector<128x12xbf16>
    %cst_19 = arith.constant dense<0.000000e+00> : vector<16x12xf32>
    %23 = tpu.matmul %21, %22, %cst_19 {dimension_numbers = #tpu.dot_dimension_numbers<[1], [0], [0], [1], [0, 0, 1, 1], [], []>} : vector<16x128xbf16>, vector<128x12xbf16>, vector<16x12xf32> -> vector<16x12xf32>
    %c0_20 = arith.constant 0 : index
    %c0_21 = arith.constant 0 : index
    %24 = vector.load %arg9[%c0_20, %c0_21] : memref<1x12xf32, #tpu.memory_space<vmem>>, vector<1x12xf32>
    %25 = vector.broadcast %24 : vector<1x12xf32> to vector<16x12xf32>
    %26 = arith.addf %23, %25 : vector<16x12xf32>
    %27 = math.tanh %26 : vector<16x12xf32>
    %28 = arith.truncf %27 : vector<16x12xf32> to vector<16x12xbf16>
    %c0_22 = arith.constant 0 : index
    %c0_23 = arith.constant 0 : index
    %29 = vector.load %arg10[%c0_22, %c0_23] : memref<12x64xbf16, #tpu.memory_space<vmem>>, vector<12x64xbf16>
    %cst_24 = arith.constant dense<0.000000e+00> : vector<16x64xf32>
    %30 = tpu.matmul %28, %29, %cst_24 {dimension_numbers = #tpu.dot_dimension_numbers<[1], [0], [0], [1], [0, 0, 1, 1], [], []>} : vector<16x12xbf16>, vector<12x64xbf16>, vector<16x64xf32> -> vector<16x64xf32>
    %c0_25 = arith.constant 0 : index
    %c0_26 = arith.constant 0 : index
    %31 = vector.load %arg11[%c0_25, %c0_26] : memref<1x64xf32, #tpu.memory_space<vmem>>, vector<1x64xf32>
    %32 = vector.broadcast %31 : vector<1x64xf32> to vector<16x64xf32>
    %33 = arith.addf %30, %32 : vector<16x64xf32>
    %34 = math.tanh %33 : vector<16x64xf32>
    %35 = arith.truncf %34 : vector<16x64xf32> to vector<16x64xbf16>
    %c0_27 = arith.constant 0 : index
    %c0_28 = arith.constant 0 : index
    %36 = vector.load %arg12[%c0_27, %c0_28] : memref<64x896xbf16, #tpu.memory_space<vmem>>, vector<64x896xbf16>
    %cst_29 = arith.constant dense<0.000000e+00> : vector<16x896xf32>
    %37 = tpu.matmul %35, %36, %cst_29 {dimension_numbers = #tpu.dot_dimension_numbers<[1], [0], [0], [1], [0, 0, 1, 1], [], []>} : vector<16x64xbf16>, vector<64x896xbf16>, vector<16x896xf32> -> vector<16x896xf32>
    %c0_30 = arith.constant 0 : index
    %c0_31 = arith.constant 0 : index
    %38 = vector.load %arg13[%c0_30, %c0_31] : memref<1x896xf32, #tpu.memory_space<vmem>>, vector<1x896xf32>
    %39 = vector.broadcast %38 : vector<1x896xf32> to vector<16x896xf32>
    %40 = arith.addf %37, %39 : vector<16x896xf32>
    %41 = arith.negf %40 : vector<16x896xf32>
    %42 = math.exp %41 : vector<16x896xf32>
    %cst_32 = arith.constant 1.000000e+00 : f32
    %43 = vector.broadcast %cst_32 : f32 to vector<16x896xf32>
    %44 = arith.addf %43, %42 : vector<16x896xf32>
    %45 = arith.divf %43, %44 : vector<16x896xf32>
    %46 = arith.truncf %45 : vector<16x896xf32> to vector<16x896xbf16>
    %c0_33 = arith.constant 0 : index
    %c0_34 = arith.constant 0 : index
    %47 = vector.load %arg15[%c0_33, %c0_34] : memref<16x896xbf16, #tpu.memory_space<vmem>>, vector<16x896xbf16>
    tpu.vector_store %arg15[%c0_33, %c0_34], %46 {strides = array<i32>} : memref<16x896xbf16, #tpu.memory_space<vmem>>, vector<16x896xbf16>,
    return
  }
  func.func @transform_0(%arg0: i32) -> (i32, i32) {
    %c0_i32 = arith.constant 0 : i32
    %c0_i32_0 = arith.constant 0 : i32
    return %arg0, %c0_i32 : i32, i32
  }
  func.func @transform_1(%arg0: i32) -> (i32, i32) {
    %c0_i32 = arith.constant 0 : i32
    %c0_i32_0 = arith.constant 0 : i32
    %c0_i32_1 = arith.constant 0 : i32
    return %c0_i32, %c0_i32_0 : i32, i32
  }
  func.func @transform_2(%arg0: i32) -> (i32, i32) {
    %c0_i32 = arith.constant 0 : i32
    %c0_i32_0 = arith.constant 0 : i32
    %c0_i32_1 = arith.constant 0 : i32
    return %c0_i32, %c0_i32_0 : i32, i32
  }
  func.func @transform_3(%arg0: i32) -> (i32, i32) {
    %c0_i32 = arith.constant 0 : i32
    %c0_i32_0 = arith.constant 0 : i32
    %c0_i32_1 = arith.constant 0 : i32
    return %c0_i32, %c0_i32_0 : i32, i32
  }
  func.func @transform_4(%arg0: i32) -> (i32, i32) {
    %c0_i32 = arith.constant 0 : i32
    %c0_i32_0 = arith.constant 0 : i32
    %c0_i32_1 = arith.constant 0 : i32
    return %c0_i32, %c0_i32_0 : i32, i32
  }
  func.func @transform_5(%arg0: i32) -> (i32, i32) {
    %c0_i32 = arith.constant 0 : i32
    %c0_i32_0 = arith.constant 0 : i32
    %c0_i32_1 = arith.constant 0 : i32
    return %c0_i32, %c0_i32_0 : i32, i32
  }
  func.func @transform_6(%arg0: i32) -> (i32, i32) {
    %c0_i32 = arith.constant 0 : i32
    %c0_i32_0 = arith.constant 0 : i32
    %c0_i32_1 = arith.constant 0 : i32
    return %c0_i32, %c0_i32_0 : i32, i32
  }
  func.func @transform_7(%arg0: i32) -> (i32, i32) {
    %c0_i32 = arith.constant 0 : i32
    %c0_i32_0 = arith.constant 0 : i32
    %c0_i32_1 = arith.constant 0 : i32
    return %c0_i32, %c0_i32_0 : i32, i32
  }
  func.func @transform_8(%arg0: i32) -> (i32, i32) {
    %c0_i32 = arith.constant 0 : i32
    %c0_i32_0 = arith.constant 0 : i32
    %c0_i32_1 = arith.constant 0 : i32
    return %c0_i32, %c0_i32_0 : i32, i32
  }
  func.func @transform_9(%arg0: i32) -> (i32, i32) {
    %c0_i32 = arith.constant 0 : i32
    %c0_i32_0 = arith.constant 0 : i32
    %c0_i32_1 = arith.constant 0 : i32
    return %c0_i32, %c0_i32_0 : i32, i32
  }
  func.func @transform_10(%arg0: i32) -> (i32, i32) {
    %c0_i32 = arith.constant 0 : i32
    %c0_i32_0 = arith.constant 0 : i32
    %c0_i32_1 = arith.constant 0 : i32
    return %c0_i32, %c0_i32_0 : i32, i32
  }
  func.func @transform_11(%arg0: i32) -> (i32, i32) {
    %c0_i32 = arith.constant 0 : i32
    %c0_i32_0 = arith.constant 0 : i32
    %c0_i32_1 = arith.constant 0 : i32
    return %c0_i32, %c0_i32_0 : i32, i32
  }
  func.func @transform_12(%arg0: i32) -> (i32, i32) {
    %c0_i32 = arith.constant 0 : i32
    %c0_i32_0 = arith.constant 0 : i32
    %c0_i32_1 = arith.constant 0 : i32
    return %c0_i32, %c0_i32_0 : i32, i32
  }
  func.func @transform_13(%arg0: i32) -> (i32, i32) {
    %c0_i32 = arith.constant 0 : i32
    %c0_i32_0 = arith.constant 0 : i32
    return %arg0, %c0_i32 : i32, i32
  }
  func.func @transform_14(%arg0: i32) -> (i32, i32) {
    %c0_i32 = arith.constant 0 : i32
    %c0_i32_0 = arith.constant 0 : i32
    return %arg0, %c0_i32 : i32, i32
  }
}

</mosaic_0001>

<bundles_post_ra>
// kernel: autoencoder_forward.1
= control target key start
LH: loop header
LB: loop body
LE: loop exit
PB: predicated region body
PF: predicated region fallthrough
CT: control target
= control target key end

     0   :  { %v2091_v38 = vmov 0.0   ;;  %vm2092_vm0 = vmmov 0   ;;  %vm752_vm1 = vcmask 523264   ;;  %vm818_vm2 = vcmask 1045504   ;;  %s2597_s1 = inlined_call_operand.vmem [shape: bf16[896,64], index: 1, kind: input, shape index: {}]   ;;  %s2598_s0 = inlined_call_operand.vmem [shape: bf16[16,896], index: 0, kind: input, shape index: {}]   ;;  %s2599_s3 = inlined_call_operand.vmem [shape: bf16[64,12], index: 3, kind: input, shape index: {}]   ;;  %s2600_s2 = inlined_call_operand.vmem [shape: f32[1,64], index: 2, kind: input, shape index: {}]   ;;  %s2601_s5 = inlined_call_operand.vmem [shape: bf16[12,128], index: 5, kind: input, shape index: {}]   ;;  %s2602_s7 = inlined_call_operand.vmem [shape: bf16[128,12], index: 7, kind: input, shape index: {}]   ;;  %s2603_s4 = inlined_call_operand.vmem [shape: f32[1,12], index: 4, kind: input, shape index: {}]   ;;  %s2604_s6 = inlined_call_operand.vmem [shape: f32[1,128], index: 6, kind: input, shape index: {}]   ;;  %s2605_s13 = inlined_call_operand.vmem [shape: f32[16,128], index: 13, kind: output, shape index: {0}]   ;;  %s2606_s9 = inlined_call_operand.vmem [shape: bf16[12,64], index: 9, kind: input, shape index: {}]   ;;  %s2607_s8 = inlined_call_operand.vmem [shape: f32[1,12], index: 8, kind: input, shape index: {}]   ;;  %s2608_s11 = inlined_call_operand.vmem [shape: bf16[64,896], index: 11, kind: input, shape index: {}]   ;;  %s2609_s10 = inlined_call_operand.vmem [shape: f32[1,64], index: 10, kind: input, shape index: {}]   ;;  %s2610_s12 = inlined_call_operand.vmem [shape: f32[1,896], index: 12, kind: input, shape index: {}]   ;;  %s2611_s14 = inlined_call_operand.vmem [shape: bf16[16,896], index: 14, kind: output, shape index: {1}]  }
   0x1   :  { %v1899_v0 = vld [vmem:[%s2597_s1 + $0x40] sm:$0xff]   ;;  %v1903_v4 = vld [vmem:[%s2597_s1 + $0x48] sm:$0xff]   ;;  %v1907_v8 = vld [vmem:[%s2597_s1 + $0x50] sm:$0xff]   ;;  %vm814_vm3 = vcmask 97280  }
   0x2   :  { %v1900_v1 = vld [vmem:[%s2597_s1] sm:$0xff]   ;;  %1722 = vmatprep.subr.bf16.mxu0 %v1899_v0  ;;  %v1904_v5 = vld [vmem:[%s2597_s1 + $0x8] sm:$0xff]   ;;  %v1908_v9 = vld [vmem:[%s2597_s1 + $0x10] sm:$0xff]  }
   0x3   :  { %v1901_v2 = vld [vmem:[%s2597_s1 + $0xc0] sm:$0xff]   ;;  %1723 = vmatpush3.bf16.msra.mxu0 %v1900_v1  ;;  %v1905_v6 = vld [vmem:[%s2597_s1 + $0xc8] sm:$0xff]   ;;  %v1909_v10 = vld [vmem:[%s2597_s1 + $0xd0] sm:$0xff]  }
   0x4   :  { %v1902_v3 = vld [vmem:[%s2597_s1 + $0x80] sm:$0xff]   ;;  %1744 = vmatprep.subr.bf16.mxu1 %v1901_v2  ;;  %1724 = vmatprep.subr.bf16.mxu0 %v1903_v4  ;;  %v1906_v7 = vld [vmem:[%s2597_s1 + $0x88] sm:$0xff]   ;;  %v1910_v11 = vld [vmem:[%s2597_s1 + $0x90] sm:$0xff]  }
   0x5   :  { %1745 = vmatpush3.bf16.msra.mxu1 %v1902_v3  ;;  %v1911_v12 = vld [vmem:[%s2597_s1 + $0x58] sm:$0xff]   ;;  %v1915_v16 = vld [vmem:[%s2597_s1 + $0x60] sm:$0xff]   ;;  %v1919_v20 = vld [vmem:[%s2597_s1 + $0x68] sm:$0xff]  }
   0x6   :  { %1746 = vmatprep.subr.bf16.mxu1 %v1905_v6  ;;  %v1912_v13 = vld [vmem:[%s2597_s1 + $0x18] sm:$0xff]   ;;  %v1916_v17 = vld [vmem:[%s2597_s1 + $0x20] sm:$0xff]   ;;  %v1920_v21 = vld [vmem:[%s2597_s1 + $0x28] sm:$0xff]  }
   0x7   :  { %1725 = vmatpush3.bf16.msra.mxu0 %v1904_v5  ;;  %v1913_v14 = vld [vmem:[%s2597_s1 + $0xd8] sm:$0xff]   ;;  %v1917_v18 = vld [vmem:[%s2597_s1 + $0xe0] sm:$0xff]   ;;  %v1921_v22 = vld [vmem:[%s2597_s1 + $0xe8] sm:$0xff]  }
   0x8   :  { %1726 = vmatprep.subr.bf16.mxu0 %v1907_v8  ;;  %v1914_v15 = vld [vmem:[%s2597_s1 + $0x98] sm:$0xff]   ;;  %v1918_v19 = vld [vmem:[%s2597_s1 + $0xa0] sm:$0xff]   ;;  %v1922_v23 = vld [vmem:[%s2597_s1 + $0xa8] sm:$0xff]  }
   0x9   :  { %1747 = vmatpush3.bf16.msra.mxu1 %v1906_v7  ;;  %v1923_v24 = vld [vmem:[%s2597_s1 + $0x70] sm:$0xff]   ;;  %v1927_v28 = vld [vmem:[%s2597_s1 + $0x78] sm:$0xff]   ;;  %v1932_v32 = vld [vmem:[%s2598_s0 + $0x4] ss:$28 sps:$4 sm:$0xff]  }
   0xa   :  { %1748 = vmatprep.subr.bf16.mxu1 %v1909_v10  ;;  %v1924_v25 = vld [vmem:[%s2597_s1 + $0x30] sm:$0xff]   ;;  %v1928_v29 = vld [vmem:[%s2597_s1 + $0x38] sm:$0xff]   ;;  %578 = vmatprep.mubr.bf16.mxu0 %v1932_v32  ;;  %v1934_v34 = vld [vmem:[%s2597_s1 + $0x140] sm:$0xff]  }
   0xb   :  { %1727 = vmatpush3.bf16.msra.mxu0 %v1908_v9  ;;  %v1925_v26 = vld [vmem:[%s2597_s1 + $0xf0] sm:$0xff]   ;;  %v1929_v30 = vld [vmem:[%s2597_s1 + $0xf8] sm:$0xff]   ;;  %v1935_v35 = vld [vmem:[%s2598_s0 + $0x8] ss:$28 sps:$4 sm:$0xff]  }
   0xc   :  { %1728 = vmatprep.subr.bf16.mxu0 %v1911_v12  ;;  %v1926_v27 = vld [vmem:[%s2597_s1 + $0xb0] sm:$0xff]   ;;  %v1930_v31 = vld [vmem:[%s2598_s0] ss:$28 sps:$4 sm:$0xff]   ;;  %v1937_v36 = vld [vmem:[%s2598_s0 + $0xc] ss:$28 sps:$4 sm:$0xff]  }
   0xd   :  { %1749 = vmatpush3.bf16.msra.mxu1 %v1910_v11  ;;  %v1933_v33 = vld [vmem:[%s2597_s1 + $0xb8] sm:$0xff]   ;;  %v1938_v37 = vld [vmem:[%s2597_s1 + $0x100] sm:$0xff]   ;;  %619 = vmatprep.mubr.bf16.mxu1 %v1937_v36  ;;  %v1940_v40 = vld [vmem:[%s2597_s1 + $0x148] sm:$0xff]  }
   0xe   :  { %1750 = vmatprep.subr.bf16.mxu1 %v1913_v14  ;;  %v1939_v39 = vld [vmem:[%s2597_s1 + $0x180] sm:$0xff]   ;;  %v1941_v41 = vld [vmem:[%s2597_s1 + $0x108] sm:$0xff]   ;;  %v1943_v43 = vld [vmem:[%s2597_s1 + $0x150] sm:$0xff]  }
   0xf   :  { %1729 = vmatpush3.bf16.msra.mxu0 %v1912_v13  ;;  %v1942_v42 = vld [vmem:[%s2597_s1 + $0x188] sm:$0xff]   ;;  %v1944_v44 = vld [vmem:[%s2597_s1 + $0x110] sm:$0xff]   ;;  %v1946_v46 = vld [vmem:[%s2597_s1 + $0x158] sm:$0xff]  }
  0x10   :  { %1730 = vmatprep.subr.bf16.mxu0 %v1915_v16  ;;  %v1945_v45 = vld [vmem:[%s2597_s1 + $0x190] sm:$0xff]   ;;  %v1947_v47 = vld [vmem:[%s2597_s1 + $0x118] sm:$0xff]   ;;  %v1949_v49 = vld [vmem:[%s2597_s1 + $0x160] sm:$0xff]  }
  0x11   :  { %1751 = vmatpush3.bf16.msra.mxu1 %v1914_v15  ;;  %v1948_v48 = vld [vmem:[%s2597_s1 + $0x198] sm:$0xff]   ;;  %v1950_v50 = vld [vmem:[%s2597_s1 + $0x120] sm:$0xff]   ;;  %v1952_v52 = vld [vmem:[%s2597_s1 + $0x168] sm:$0xff]  }
  0x12   :  { %1752 = vmatprep.subr.bf16.mxu1 %v1917_v18  ;;  %v1951_v51 = vld [vmem:[%s2597_s1 + $0x1a0] sm:$0xff]   ;;  %v1953_v53 = vld [vmem:[%s2597_s1 + $0x128] sm:$0xff]   ;;  %v1955_v55 = vld [vmem:[%s2597_s1 + $0x170] sm:$0xff]  }
  0x13   :  { %1731 = vmatpush3.bf16.msra.mxu0 %v1916_v17  ;;  %v1954_v54 = vld [vmem:[%s2597_s1 + $0x1a8] sm:$0xff]   ;;  %v1956_v56 = vld [vmem:[%s2597_s1 + $0x130] sm:$0xff]   ;;  %v1958_v59 = vld [vmem:[%s2597_s1 + $0x178] sm:$0xff]  }
  0x14   :  { %1732 = vmatprep.subr.bf16.mxu0 %v1919_v20  ;;  %v1957_v57 = vld [vmem:[%s2597_s1 + $0x1b0] sm:$0xff]   ;;  %v1959_v60 = vld [vmem:[%s2597_s1 + $0x138] sm:$0xff]   ;;  %v1965_v0 = vld [vmem:[%s2599_s3] sm:$0xff]  }
  0x15   :  { %1753 = vmatpush3.bf16.msra.mxu1 %v1918_v19  ;;  %v1962_v58 = vld [vmem:[%s2598_s0 + $0x14] ss:$28 sps:$4 sm:$0xff]   ;;  %v1963_v61 = vld [vmem:[%s2597_s1 + $0x1b8] sm:$0xff]   ;;  %v1966_v1 = vld [vmem:[%s2599_s3 + $0x8] sm:$0xff]  }
  0x16   :  { %1754 = vmatprep.subr.bf16.mxu1 %v1921_v22  ;;  %v1960_v62 = vld [vmem:[%s2598_s0 + $0x10] ss:$28 sps:$4 sm:$0xff]   ;;  %v1964_v63 = vld [vmem:[%s2598_s0 + $0x18] ss:$28 sps:$4 sm:$0xff]   ;;  %v1575_v5 = vld [vmem:[%s2600_s2] ss:$0 sm:$0xff] }
  0x17   :  { %1733 = vmatpush3.bf16.msra.mxu0 %v1920_v21  ;;  %v1967_v2 = vld [vmem:[%s2599_s3 + $0x10] sm:$0xff]   ;;  %v1968_v3 = vld [vmem:[%s2599_s3 + $0x18] sm:$0xff]  }
  0x18   :  { %1734 = vmatprep.subr.bf16.mxu0 %v1923_v24 }
  0x19   :  { %1755 = vmatpush3.bf16.msra.mxu1 %v1922_v23 }
  0x1a   :  { %1756 = vmatprep.subr.bf16.mxu1 %v1925_v26 }
  0x1b   :  { %1735 = vmatpush3.bf16.msra.mxu0 %v1924_v25 }
  0x1c   :  { %1736 = vmatprep.subr.bf16.mxu0 %v1927_v28 }
  0x1d   :  { %1757 = vmatpush3.bf16.msra.mxu1 %v1926_v27 }
  0x1e   :  { %1758 = vmatprep.subr.bf16.mxu1 %v1929_v30 }
  0x1f   :  { %1737 = vmatpush3.bf16.msra.mxu0 %v1928_v29 }
  0x20   :  { %1766 = vmatprep.subr.bf16.mxu0 %v1934_v34 }
  0x21   :  { %1759 = vmatpush3.bf16.msra.mxu1 %v1933_v33 }
  0x22   :  { %579 = vmatmul.mubr.bf16.vlgmr.msra.gmra.mrb[0].mxu0 %v1930_v31  ;;  %1820 = vmatprep.subr.bf16.mxu1 %v2091_v38 }
  0x23   :  { %1767 = vmatpush3.bf16.msra.mxu0 %v1938_v37  ;;  %660 = vmatprep.mubr.bf16.mxu0 %v1962_v58  ;;  %v1977_v58 = vld [vmem:[%s2602_s7 + $0x38] sm:$0xff]  }
  0x24   :  { %620 = vmatmul.mubr.bf16.vlgmr.msra.gmra.mrb[0].mxu1 %v1935_v35  ;;  %1768 = vmatprep.subr.bf16.mxu0 %v1940_v40 }
  0x25   :  { %1821 = vmatpush3.bf16.msra.mxu1 %v1939_v39  ;;  %1836 = vmatprep.mubr.msk.bf16.mxu1 %vm2092_vm0, %v2091_v38  ;;  %v1969_v39 = vld [vmem:[%s2601_s5] sm:$0x3f]  }
  0x26   :  { %1822 = vmatprep.subr.bf16.mxu1 %v2091_v38  ;;  %v820_v40 = vsel %vm818_vm2, %v1969_v39, 0 }
  0x27   :  { %1769 = vmatpush3.bf16.msra.mxu0 %v1941_v41  ;;  %v1639_v41 = vld [vmem:[%s2603_s4] ss:$0 sm:$0xff] }
  0x28   :  { %1770 = vmatprep.subr.bf16.mxu0 %v1943_v43 }
  0x29   :  { %1823 = vmatpush3.bf16.msra.mxu1 %v1942_v42 }
  0x2a   :  { %1824 = vmatprep.subr.bf16.mxu1 %v2091_v38 }
  0x2b   :  { %1771 = vmatpush3.bf16.msra.mxu0 %v1944_v44 }
  0x2c   :  { %1772 = vmatprep.subr.bf16.mxu0 %v1946_v46 }
  0x2d   :  { %1825 = vmatpush3.bf16.msra.mxu1 %v1945_v45 }
  0x2e   :  { %1826 = vmatprep.subr.bf16.mxu1 %v2091_v38 }
  0x2f   :  { %1773 = vmatpush3.bf16.msra.mxu0 %v1947_v47 }
  0x30   :  { %1774 = vmatprep.subr.bf16.mxu0 %v1949_v49 }
  0x31   :  { %1827 = vmatpush3.bf16.msra.mxu1 %v1948_v48 }
  0x32   :  { %1828 = vmatprep.subr.bf16.mxu1 %v2091_v38 }
  0x33   :  { %1775 = vmatpush3.bf16.msra.mxu0 %v1950_v50  ;;  %v1970_v50 = vld [vmem:[%s2602_s7] sm:$0xff]  }
  0x34   :  { %1776 = vmatprep.subr.bf16.mxu0 %v1952_v52  ;;  %v1971_v52 = vld [vmem:[%s2602_s7 + $0x8] sm:$0xff]  }
  0x35   :  { %1829 = vmatpush3.bf16.msra.mxu1 %v1951_v51 }
  0x36   :  { %1830 = vmatprep.subr.bf16.mxu1 %v2091_v38 }
  0x37   :  { %1777 = vmatpush3.bf16.msra.mxu0 %v1953_v53  ;;  %v1972_v53 = vld [vmem:[%s2602_s7 + $0x10] sm:$0xff]  }
  0x38   :  { %1778 = vmatprep.subr.bf16.mxu0 %v1955_v55  ;;  %v1974_v55 = vld [vmem:[%s2602_s7 + $0x20] sm:$0xff]  }
  0x39   :  { %1831 = vmatpush3.bf16.msra.mxu1 %v1954_v54  ;;  %v1973_v54 = vld [vmem:[%s2602_s7 + $0x18] sm:$0xff]  }
  0x3a   :  { %1832 = vmatprep.subr.bf16.mxu1 %v2091_v38 }
  0x3b   :  { %1779 = vmatpush3.bf16.msra.mxu0 %v1956_v56  ;;  %v1975_v56 = vld [vmem:[%s2602_s7 + $0x28] sm:$0xff]  }
  0x3c   :  { %1780 = vmatprep.subr.bf16.mxu0 %v1958_v59  ;;  %v1645_v59 = vld [vmem:[%s2604_s6] ss:$0 sm:$0xff] }
  0x3d   :  { %1833 = vmatpush3.bf16.msra.mxu1 %v1957_v57  ;;  %v1976_v57 = vld [vmem:[%s2602_s7 + $0x30] sm:$0xff]  }
  0x3e   :  { %1834 = vmatprep.subr.bf16.mxu1 %v2091_v38 }
  0x3f   :  { %1781 = vmatpush3.bf16.msra.mxu0 %v1959_v60 }
  0x40   :  { %1840 = vmatprep.subr.bf16.mxu0 %v2091_v38 }
  0x41   :  { %1835 = vmatpush3.bf16.msra.mxu1 %v1963_v61 }
  0x42   :  { %1852 = vmatprep.subr.bf16.mxu1 %v2091_v38  ;;  %661 = vmatmul.mubr.bf16.vlgmr.msra.gmra.mrb[4].mxu0 %v1960_v62 }
  0x43   :  { %1848 = vmatprep.mubr.msk.bf16.mxu0 %vm2092_vm0, %v2091_v38  ;;  %1841 = vmatpush3.bf16.msra.mxu0 %v1965_v0 }
  0x44   :  { %1837 = vmatmul.mubr.bf16.vlgmr.msra.gmra.mrb[4].mxu1 %v1964_v63  ;;  %1842 = vmatprep.subr.bf16.mxu0 %v2091_v38 }
  0x45   :  { %1854 = vmatprep.mubr.msk.bf16.mxu1 %vm2092_vm0, %v2091_v38  ;;  %1853 = vmatpush3.bf16.msra.mxu1 %v820_v40 }
  0x46   :  { %1858 = vmatprep.subr.bf16.mxu1 %v2091_v38 }
  0x47   :  { %1843 = vmatpush3.bf16.msra.mxu0 %v1966_v1 }
  0x48   :  { %1844 = vmatprep.subr.bf16.mxu0 %v2091_v38 }
  0x4b   :  { %1845 = vmatpush3.bf16.msra.mxu0 %v1967_v2 }
  0x4c   :  { %1846 = vmatprep.subr.bf16.mxu0 %v2091_v38 }
  0x4f   :  { %1847 = vmatpush3.bf16.msra.mxu0 %v1968_v3  ;;  %v1978_v3 = vld [vmem:[%s2606_s9] sm:$0x3f]  }
  0xf5   :  { %v1738_v4 = vpop.f32.mrb[0].mxu0 }
  0xf6   :  { %v1739_v6 = vpop.f32.mrb[1].mxu0 }
  0xf7   :  { %v1740_v7 = vadd.f32 %v1739_v6, %v1738_v4  ;;  %v1741_v8 = vpop.f32.mrb[2].mxu0  ;;  %v1760_v9 = vpop.f32.mrb[0].mxu1  ;;  %v999_v4 = vsel %vm818_vm2, %v1978_v3, 0 }
  0xf8   :  { %v1742_v10 = vpop.f32.mrb[3].mxu0  ;;  %v1761_v13 = vpop.f32.mrb[1].mxu1 }
  0xf9   :  { %v581_v11 = vadd.f32 %v1740_v7, %v1575_v5  ;;  %v1743_v12 = vadd.f32 %v1742_v10, %v1741_v8  ;;  %v1762_v14 = vadd.f32 %v1761_v13, %v1760_v9  ;;  %v1763_v15 = vpop.f32.mrb[2].mxu1 }
  0xfa   :  { %v1764_v17 = vpop.f32.mrb[3].mxu1 }
  0xfb   :  { %v584_v16 = vadd.f32 %v1743_v12, %v1575_v5  ;;  %v622_v18 = vadd.f32 %v1762_v14, %v581_v11  ;;  %v1765_v19 = vadd.f32 %v1764_v17, %v1763_v15  ;;  %v1648_v5 = vld [vmem:[%s2607_s8] ss:$0 sm:$0xff]  ;;  %v1982_v17 = vld [vmem:[%s2608_s11 + $0x10] ss:$28 sps:$4 sm:$0xff]  }
  0xfc   :  { %v1981_v15 = vld [vmem:[%s2608_s11 + $0x4] ss:$28 sps:$4 sm:$0xff]  }
  0xfd   :  { %v625_v20 = vadd.f32 %v1765_v19, %v584_v16  ;;  %v1979_v16 = vld [vmem:[%s2608_s11] ss:$28 sps:$4 sm:$0xff]   ;;  %1261 = vmatprep.subr.bf16.mxu0 %v1981_v15 }
  0xfe   :  { %v1987_v19 = vld [vmem:[%s2608_s11 + $0x3c] ss:$28 sps:$4 sm:$0xff]  }
 0x115   :  { %v1782_v21 = vpop.f32.mrb[4].mxu0 }
 0x116   :  { %v1783_v22 = vpop.f32.mrb[5].mxu0 }
 0x117   :  { %v703_v23 = vpop.f32.mrb[4].mxu1  ;;  %v1784_v24 = vadd.f32 %v1783_v22, %v1782_v21  ;;  %v1785_v25 = vpop.f32.mrb[6].mxu0  ;;  %v1990_v21 = vld [vmem:[%s2608_s11 + $0x4c] ss:$28 sps:$4 sm:$0xff]  }
 0x118   :  { %v1838_v26 = vpop.f32.mrb[5].mxu1  ;;  %v1786_v27 = vpop.f32.mrb[7].mxu0  ;;  %v1988_v22 = vld [vmem:[%s2608_s11 + $0x48] ss:$28 sps:$4 sm:$0xff]  }
 0x119   :  { %v706_v28 = vpop.f32.mrb[6].mxu1  ;;  %v663_v29 = vadd.f32 %v1784_v24, %v622_v18  ;;  %v1787_v30 = vadd.f32 %v1786_v27, %v1785_v25  ;;  %v1984_v18 = vld [vmem:[%s2608_s11 + $0x14] ss:$28 sps:$4 sm:$0xff]   ;;  %v1996_v25 = vld [vmem:[%s2608_s11 + $0x84] ss:$28 sps:$4 sm:$0xff]   ;;  %v2093_v27 = vmov 0  }
 0x11a   :  { %v1839_v31 = vpop.f32.mrb[7].mxu1  ;;  %v1991_v24 = vld [vmem:[%s2608_s11 + $0x70] ss:$28 sps:$4 sm:$0xff]   ;;  %v1994_v26 = vld [vmem:[%s2608_s11 + $0x80] ss:$28 sps:$4 sm:$0xff]  }
 0x11b   :  { %v704_v32 = vadd.f32 %v703_v23, %v663_v29  ;;  %v666_v33 = vadd.f32 %v1787_v30, %v625_v20  ;;  %v1985_v20 = vld [vmem:[%s2608_s11 + $0x38] ss:$28 sps:$4 sm:$0xff]   ;;  %v1997_v29 = vld [vmem:[%s2608_s11 + $0xa8] ss:$28 sps:$4 sm:$0xff]  }
 0x11c   :  { %v1993_v23 = vld [vmem:[%s2608_s11 + $0x74] ss:$28 sps:$4 sm:$0xff]   ;;  %v2002_v30 = vld [vmem:[%s2608_s11 + $0xbc] ss:$28 sps:$4 sm:$0xff]  }
 0x11d   :  { %v707_v34 = vadd.f32 %v706_v28, %v666_v33  ;;  %2019 = vtanh.f32 %v704_v32  ;;  %v1999_v28 = vld [vmem:[%s2608_s11 + $0xac] ss:$28 sps:$4 sm:$0xff]   ;;  %v2000_v31 = vld [vmem:[%s2608_s11 + $0xb8] ss:$28 sps:$4 sm:$0xff]   ;;  %v1657_v33 = vld [vmem:[%s2609_s10] ss:$0 sm:$0xff] }
 0x11e   :  { %v2005_v32 = vld [vmem:[%s2608_s11 + $0xc] ss:$28 sps:$4 sm:$0xff]  }
 0x11f   :  { %2021 = vtanh.f32 %v707_v34 }
 0x127   :  { %v2020_v35 = vpop.eup %2019 }
 0x129   :  { %v2022_v36 = vpop.eup %2021 }
 0x12a   :  { %v712_v37 = vpack.c.bf16 %v2022_v36, %v2020_v35 }
 0x12c   :  { %1849 = vmatmul.mubr.msk.bf16.vlgmr.msra.gmra.mrb[8].mxu0 %vm752_vm1, %v712_v37 }
 0x12d   :  { %1262 = vmatpush1.bf16.msra.mxu0 %v1979_v16  ;;  %1293 = vmatprep.mubr.bf16.mxu0 %v2093_v27 }
 0x12e   :  { %1263 = vmatprep.subr.bf16.mxu0 %v1987_v19 }
 0x131   :  { %1264 = vmatpush1.bf16.msra.mxu0 %v1985_v20 }
 0x132   :  { %1265 = vmatprep.subr.bf16.mxu0 %v1993_v23 }
 0x135   :  { %1266 = vmatpush1.bf16.msra.mxu0 %v1991_v24 }
 0x136   :  { %1267 = vmatprep.subr.bf16.mxu0 %v1999_v28 }
 0x139   :  { %1268 = vmatpush1.bf16.msra.mxu0 %v1997_v29 }
 0x13a   :  { %1304 = vmatprep.subr.bf16.mxu0 %v2005_v32 }
 0x1ff   :  { %v790_v42 = vpop.f32.mrb[8].mxu0 }
 0x200   :  { %v791_v43 = vadd.f32 %v1639_v41, %v790_v42  ;;  %v1850_v44 = vpop.f32.mrb[9].mxu0 }
 0x201   :  { %v793_v45 = vpop.f32.mrb[10].mxu0 }
 0x202   :  { %v794_v46 = vadd.f32 %v1639_v41, %v793_v45  ;;  %v1851_v47 = vpop.f32.mrb[11].mxu0  ;;  %2023 = vtanh.f32 %v791_v43  ;;  %v2003_v43 = vld [vmem:[%s2608_s11 + $0x8] ss:$28 sps:$4 sm:$0xff]  }
 0x203   :  { %v2008_v45 = vld [vmem:[%s2608_s11 + $0x44] ss:$28 sps:$4 sm:$0xff]   ;;  %v2011_v47 = vld [vmem:[%s2608_s11 + $0x7c] ss:$28 sps:$4 sm:$0xff]  }
 0x204   :  { %2025 = vtanh.f32 %v794_v46  ;;  %v2006_v46 = vld [vmem:[%s2608_s11 + $0x40] ss:$28 sps:$4 sm:$0xff]  }
 0x20c   :  { %v2024_v48 = vpop.eup %2023 }
 0x20e   :  { %v2026_v49 = vpop.eup %2025 }
 0x20f   :  { %v799_v51 = vpack.c.bf16 %v2026_v49, %v2024_v48  ;;  %v2009_v48 = vld [vmem:[%s2608_s11 + $0x78] ss:$28 sps:$4 sm:$0xff]  }
 0x210   :  { %v2014_v49 = vld [vmem:[%s2608_s11 + $0xb4] ss:$28 sps:$4 sm:$0xff]  }
 0x211   :  { %1855 = vmatmul.mubr.msk.bf16.vlgmr.msra.gmra.mrb[8].mxu1 %vm814_vm3, %v799_v51  ;;  %v2015_v51 = vld [vmem:[%s2608_s11 + $0x18] ss:$28 sps:$4 sm:$0xff]  }
 0x212   :  { %1859 = vmatpush3.bf16.msra.mxu1 %v1970_v50  ;;  %1874 = vmatprep.mubr.msk.bf16.mxu1 %vm2092_vm0, %v2091_v38  ;;  %v2012_v50 = vld [vmem:[%s2608_s11 + $0xb0] ss:$28 sps:$4 sm:$0xff]  }
 0x213   :  { %1860 = vmatprep.subr.bf16.mxu1 %v2091_v38 }
 0x216   :  { %1861 = vmatpush3.bf16.msra.mxu1 %v1971_v52  ;;  %v2016_v52 = vld [vmem:[%s2608_s11 + $0x50] ss:$28 sps:$4 sm:$0xff]  }
 0x217   :  { %1862 = vmatprep.subr.bf16.mxu1 %v2091_v38 }
 0x21a   :  { %1863 = vmatpush3.bf16.msra.mxu1 %v1972_v53  ;;  %v2017_v53 = vld [vmem:[%s2608_s11 + $0x88] ss:$28 sps:$4 sm:$0xff]  }
 0x21b   :  { %1864 = vmatprep.subr.bf16.mxu1 %v2091_v38 }
 0x21e   :  { %1865 = vmatpush3.bf16.msra.mxu1 %v1973_v54  ;;  %v2018_v54 = vld [vmem:[%s2608_s11 + $0xc0] ss:$28 sps:$4 sm:$0xff]  }
 0x21f   :  { %1866 = vmatprep.subr.bf16.mxu1 %v2091_v38 }
 0x222   :  { %1867 = vmatpush3.bf16.msra.mxu1 %v1974_v55  ;;  %v1079_v55 = vlaneseq }
 0x223   :  { %1868 = vmatprep.subr.bf16.mxu1 %v2091_v38 }
 0x226   :  { %1869 = vmatpush3.bf16.msra.mxu1 %v1975_v56  ;;  %v2552_v56 = vshrl.u32 %v1079_v55, 7 }
 0x227   :  { %1870 = vmatprep.subr.bf16.mxu1 %v2091_v38 }
 0x22a   :  { %1871 = vmatpush3.bf16.msra.mxu1 %v1976_v57  ;;  %v1081_v57 = vsub.s32 0, %v2552_v56 }
 0x22b   :  { %1872 = vmatprep.subr.bf16.mxu1 %v2091_v38 }
 0x22e   :  { %1873 = vmatpush3.bf16.msra.mxu1 %v1977_v58  ;;  %v1097_v58 = vsub.s32 4, %v2552_v56 }
 0x22f   :  { %1878 = vmatprep.subr.bf16.mxu1 %v2091_v38 }
 0x2e4   :  { %v856_v60 = vpop.f32.mrb[8].mxu1 }
 0x2e5   :  { %v857_v61 = vadd.f32 %v1645_v59, %v856_v60  ;;  %v1856_v62 = vpop.f32.mrb[9].mxu1  ;;  %v1085_v60 = vsub.s32 1, %v2552_v56 }
 0x2e6   :  { %v859_v63 = vpop.f32.mrb[10].mxu1 }
 0x2e7   :  { %863 = vst [vmem:[%s2605_s13] sm:$0xff] %v857_v61  ;;  %v860_v0 = vadd.f32 %v1645_v59, %v859_v63  ;;  %v1857_v1 = vpop.f32.mrb[11].mxu1  ;;  %v2559_v59 = vld [vmem:[%s2610_s12] sm:$0xff] }
 0x2e8   :  { %v1098_v62 = vrot.slane %v2559_v59, %v1097_v58  ;;  %v1086_v63 = vrot.slane %v2559_v59, %v1085_v60  ;;  %v1105_v60 = vsub.s32 6, %v2552_v56 }
 0x2e9   :  { %864 = vst [vmem:[%s2605_s13 + $0x8] sm:$0xff] %v860_v0  ;;  %v865_v2 = vpack.c.bf16 %v860_v0, %v857_v61  ;;  %v1101_v61 = vsub.s32 5, %v2552_v56 }
 0x2eb   :  { %1875 = vmatmul.mubr.bf16.vlgmr.msra.gmra.mrb[12].mxu1 %v865_v2  ;;  %v1102_v0 = vrot.slane %v2559_v59, %v1101_v61 }
 0x2ec   :  { %1880 = vmatprep.mubr.msk.bf16.mxu1 %vm2092_vm0, %v2091_v38  ;;  %1879 = vmatpush3.bf16.msra.mxu1 %v999_v4 }
 0x2ed   :  { %1347 = vmatprep.subr.bf16.mxu1 %v1984_v18 }
 0x3be   :  { %v971_v6 = vpop.f32.mrb[12].mxu1 }
 0x3bf   :  { %v972_v7 = vadd.f32 %v1648_v5, %v971_v6  ;;  %v1876_v8 = vpop.f32.mrb[13].mxu1 }
 0x3c0   :  { %v974_v9 = vpop.f32.mrb[14].mxu1 }
 0x3c1   :  { %v975_v10 = vadd.f32 %v1648_v5, %v974_v9  ;;  %v1877_v11 = vpop.f32.mrb[15].mxu1  ;;  %2027 = vtanh.f32 %v972_v7 }
 0x3c3   :  { %2029 = vtanh.f32 %v975_v10 }
 0x3cb   :  { %v2028_v12 = vpop.eup %2027 }
 0x3cd   :  { %v2030_v13 = vpop.eup %2029 }
 0x3ce   :  { %v980_v14 = vpack.c.bf16 %v2030_v13, %v2028_v12 }
 0x3d0   :  { %1881 = vmatmul.mubr.msk.bf16.vlgmr.msra.gmra.mrb[16].mxu1 %vm814_vm3, %v980_v14 }
 0x3d1   :  { %1348 = vmatpush1.bf16.msra.mxu1 %v1982_v17  ;;  %1379 = vmatprep.mubr.bf16.mxu1 %v2093_v27 }
 0x3d2   :  { %1349 = vmatprep.subr.bf16.mxu1 %v1990_v21 }
 0x3d5   :  { %1350 = vmatpush1.bf16.msra.mxu1 %v1988_v22 }
 0x3d6   :  { %1351 = vmatprep.subr.bf16.mxu1 %v1996_v25  ;;  %v1089_v25 = vsub.s32 2, %v2552_v56 }
 0x3d9   :  { %1352 = vmatpush1.bf16.msra.mxu1 %v1994_v26  ;;  %v1093_v26 = vsub.s32 3, %v2552_v56 }
 0x3da   :  { %1353 = vmatprep.subr.bf16.mxu1 %v2002_v30 }
 0x3db   :  { %v1094_v29 = vrot.slane %v2559_v59, %v1093_v26 }
 0x3dd   :  { %1354 = vmatpush1.bf16.msra.mxu1 %v2000_v31 }
 0x4a3   :  { %v1035_v34 = vpop.f32.mrb[16].mxu1 }
 0x4a4   :  { %v1036_v35 = vadd.f32 %v1657_v33, %v1035_v34  ;;  %v1882_v36 = vpop.f32.mrb[17].mxu1 }
 0x4a5   :  { %v1038_v37 = vpop.f32.mrb[18].mxu1 }
 0x4a6   :  { %v1039_v39 = vadd.f32 %v1657_v33, %v1038_v37  ;;  %v1883_v40 = vpop.f32.mrb[19].mxu1  ;;  %2031 = vtanh.f32 %v1036_v35 }
 0x4a8   :  { %2033 = vtanh.f32 %v1039_v39 }
 0x4b0   :  { %v2032_v41 = vpop.eup %2031 }
 0x4b2   :  { %v2034_v42 = vpop.eup %2033 }
 0x4b3   :  { %v1044_v44 = vpack.c.bf16 %v2034_v42, %v2032_v41 }
 0x4b5   :  { %1688 = vmatmul.mubr.msk.bf16.vlgmr.msra.gmra.mrb[12].mxu0 %vm752_vm1, %v1044_v44  ;;  %1690 = vmatmul.mubr.msk.bf16.vlgmr.msra.gmra.mrb[20].mxu1 %vm752_vm1, %v1044_v44 }
 0x4b6   :  { %1305 = vmatpush1.bf16.msra.mxu0 %v2003_v43  ;;  %1336 = vmatprep.mubr.bf16.mxu0 %v2093_v27  ;;  %v1090_v27 = vrot.slane %v2559_v59, %v1089_v25 }
 0x4b7   :  { %1306 = vmatprep.subr.bf16.mxu0 %v2008_v45 }
 0x4ba   :  { %1307 = vmatpush1.bf16.msra.mxu0 %v2006_v46 }
 0x4bb   :  { %1308 = vmatprep.subr.bf16.mxu0 %v2011_v47 }
 0x4be   :  { %1309 = vmatpush1.bf16.msra.mxu0 %v2009_v48 }
 0x4bf   :  { %1310 = vmatprep.subr.bf16.mxu0 %v2014_v49 }
 0x4c2   :  { %1311 = vmatpush1.bf16.msra.mxu0 %v2012_v50 }
 0x4c3   :  { %1884 = vmatprep.subr.bf16.mxu0 %v2091_v38 }
 0x4c5   :  { %1689 = vmatmul.mubr.msk.bf16.vlgmr.msra.gmra.mrb[16].mxu0 %vm752_vm1, %v1044_v44 }
 0x4c6   :  { %1885 = vmatpush3.bf16.msra.mxu0 %v2015_v51  ;;  %1892 = vmatprep.mubr.msk.bf16.mxu0 %vm2092_vm0, %v2091_v38 }
 0x4c7   :  { %1886 = vmatprep.subr.bf16.mxu0 %v2091_v38 }
 0x4ca   :  { %1887 = vmatpush3.bf16.msra.mxu0 %v2016_v52 }
 0x4cb   :  { %1888 = vmatprep.subr.bf16.mxu0 %v2091_v38 }
 0x4ce   :  { %1889 = vmatpush3.bf16.msra.mxu0 %v2017_v53 }
 0x4cf   :  { %1890 = vmatprep.subr.bf16.mxu0 %v2091_v38  ;;  %v1082_v38 = vrot.slane %v2559_v59, %v1081_v57 }
 0x4d2   :  { %1891 = vmatpush3.bf16.msra.mxu0 %v2018_v54 }
 0x4d5   :  { %1893 = vmatmul.mubr.msk.bf16.vlgmr.msra.gmra.mrb[20].mxu0 %vm752_vm1, %v1044_v44 }
 0x588   :  { %v1295_v1 = vpop.f32.mrb[12].mxu0  ;;  %v1381_v2 = vpop.f32.mrb[20].mxu1 }
 0x589   :  { %v1296_v3 = vadd.f32 %v1295_v1, %v1082_v38  ;;  %v1382_v4 = vadd.f32 %v1381_v2, %v1098_v62  ;;  %v1297_v5 = vpop.f32.mrb[13].mxu0  ;;  %v1383_v6 = vpop.f32.mrb[21].mxu1 }
 0x58a   :  { %v1298_v7 = vadd.f32 %v1297_v5, %v1086_v63  ;;  %v1384_v8 = vadd.f32 %v1383_v6, %v1102_v0  ;;  %v1299_v9 = vpop.f32.mrb[14].mxu0  ;;  %v1385_v10 = vpop.f32.mrb[22].mxu1 }
 0x58b   :  { %v1692_v11 = vmul.f32 -1.442695, %v1296_v3  ;;  %v1696_v12 = vmul.f32 -1.442695, %v1382_v4  ;;  %v1300_v13 = vadd.f32 %v1299_v9, %v1082_v38  ;;  %v1386_v14 = vadd.f32 %v1385_v10, %v1098_v62  ;;  %v1301_v15 = vpop.f32.mrb[15].mxu0  ;;  %v1387_v16 = vpop.f32.mrb[23].mxu1 }
 0x58c   :  { %v1693_v17 = vmul.f32 -1.442695, %v1298_v7  ;;  %v1697_v18 = vmul.f32 -1.442695, %v1384_v8  ;;  %v1302_v19 = vadd.f32 %v1301_v15, %v1086_v63  ;;  %v1388_v20 = vadd.f32 %v1387_v16, %v1102_v0 }
 0x58d   :  { %2035 = vpow2.f32 %v1692_v11  ;;  %v1699_v21 = vmul.f32 -1.442695, %v1300_v13  ;;  %v1703_v22 = vmul.f32 -1.442695, %v1386_v14  ;;  %v1106_v62 = vrot.slane %v2559_v59, %v1105_v60 }
 0x58e   :  { %2037 = vpow2.f32 %v1696_v12  ;;  %v1700_v23 = vmul.f32 -1.442695, %v1302_v19  ;;  %v1704_v24 = vmul.f32 -1.442695, %v1388_v20 }
 0x58f   :  { %2039 = vpow2.f32 %v1693_v17 }
 0x590   :  { %2041 = vpow2.f32 %v1697_v18 }
 0x591   :  { %2043 = vpow2.f32 %v1699_v21 }
 0x592   :  { %2045 = vpow2.f32 %v1703_v22 }
 0x593   :  { %2047 = vpow2.f32 %v1700_v23 }
 0x594   :  { %2049 = vpow2.f32 %v1704_v24 }
 0x597   :  { %v2036_v28 = vpop.eup %2035 }
 0x598   :  { %v2038_v30 = vpop.eup %2037  ;;  %v1473_v31 = vadd.f32 1.0, %v2036_v28  ;;  %v1338_v32 = vpop.f32.mrb[16].mxu0 }
 0x599   :  { %v2040_v33 = vpop.eup %2039  ;;  %v1477_v34 = vadd.f32 1.0, %v2038_v30  ;;  %v1340_v35 = vpop.f32.mrb[17].mxu0  ;;  %v1339_v39 = vadd.f32 %v1338_v32, %v1090_v27 }
 0x59a   :  { %v2042_v36 = vpop.eup %2041  ;;  %2051 = vrcp.f32 %v1473_v31  ;;  %v1474_v37 = vadd.f32 1.0, %v2040_v33  ;;  %v1342_v40 = vpop.f32.mrb[18].mxu0  ;;  %v1341_v43 = vadd.f32 %v1340_v35, %v1094_v29 }
 0x59b   :  { %v2044_v41 = vpop.eup %2043  ;;  %2053 = vrcp.f32 %v1477_v34  ;;  %v1478_v42 = vadd.f32 1.0, %v2042_v36  ;;  %v1344_v44 = vpop.f32.mrb[19].mxu0  ;;  %v1343_v47 = vadd.f32 %v1342_v40, %v1090_v27  ;;  %v1694_v53 = vmul.f32 -1.442695, %v1339_v39 }
 0x59c   :  { %v2046_v45 = vpop.eup %2045  ;;  %2055 = vrcp.f32 %v1474_v37  ;;  %v1480_v46 = vadd.f32 1.0, %v2044_v41  ;;  %v1345_v50 = vadd.f32 %v1344_v44, %v1094_v29  ;;  %v1695_v55 = vmul.f32 -1.442695, %v1341_v43 }
 0x59d   :  { %v2048_v48 = vpop.eup %2047  ;;  %2057 = vrcp.f32 %v1478_v42  ;;  %v1484_v49 = vadd.f32 1.0, %v2046_v45  ;;  %v1701_v57 = vmul.f32 -1.442695, %v1343_v47 }
 0x59e   :  { %v2050_v51 = vpop.eup %2049  ;;  %2059 = vrcp.f32 %v1480_v46  ;;  %v1481_v52 = vadd.f32 1.0, %v2048_v48  ;;  %v1702_v58 = vmul.f32 -1.442695, %v1345_v50 }
 0x59f   :  { %2061 = vrcp.f32 %v1484_v49  ;;  %v1485_v54 = vadd.f32 1.0, %v2050_v51 }
 0x5a0   :  { %2063 = vrcp.f32 %v1481_v52 }
 0x5a1   :  { %2065 = vrcp.f32 %v1485_v54 }
 0x5a2   :  { %2067 = vpow2.f32 %v1694_v53 }
 0x5a3   :  { %2069 = vpow2.f32 %v1695_v55 }
 0x5a4   :  { %v2052_v61 = vpop.eup %2051  ;;  %2071 = vpow2.f32 %v1701_v57 }
 0x5a5   :  { %v2054_v38 = vpop.eup %2053  ;;  %2073 = vpow2.f32 %v1702_v58 }
 0x5a6   :  { %v2056_v63 = vpop.eup %2055 }
 0x5a7   :  { %v2058_v0 = vpop.eup %2057  ;;  %v1714_v1 = vpack.c.bf16 %v2056_v63, %v2052_v61 }
 0x5a8   :  { %v2060_v2 = vpop.eup %2059  ;;  %v1716_v3 = vpack.c.bf16 %v2058_v0, %v2054_v38  ;;  %v1424_v4 = vpop.f32.mrb[20].mxu0 }
 0x5a9   :  { %v2062_v5 = vpop.eup %2061  ;;  %1559 = vst [vmem:[%s2611_s14] sm:$0xff] %v1714_v1  ;;  %v1425_v56 = vadd.f32 %v1424_v4, %v1106_v62  ;;  %v1894_v6 = vpop.f32.mrb[21].mxu0 }
 0x5aa   :  { %v2064_v7 = vpop.eup %2063  ;;  %1561 = vst [vmem:[%s2611_s14 + $0x10] sm:$0xff] %v1716_v3  ;;  %v1427_v8 = vpop.f32.mrb[22].mxu0 }
 0x5ab   :  { %v2066_v59 = vpop.eup %2065  ;;  %v1718_v9 = vpack.c.bf16 %v2064_v7, %v2060_v2  ;;  %v1698_v10 = vmul.f32 -1.442695, %v1425_v56  ;;  %v1428_v11 = vadd.f32 %v1427_v8, %v1106_v62  ;;  %v1895_v12 = vpop.f32.mrb[23].mxu0 }
 0x5ac   :  { %v2068_v13 = vpop.eup %2067  ;;  %v1720_v14 = vpack.c.bf16 %v2066_v59, %v2062_v5 }
 0x5ad   :  { %v2070_v15 = vpop.eup %2069  ;;  %1563 = vst [vmem:[%s2611_s14 + $0x1c] sm:$0xff] %v1718_v9  ;;  %v1475_v16 = vadd.f32 1.0, %v2068_v13  ;;  %2075 = vpow2.f32 %v1698_v10  ;;  %v1705_v21 = vmul.f32 -1.442695, %v1428_v11 }
 0x5ae   :  { %v2072_v17 = vpop.eup %2071  ;;  %1565 = vst [vmem:[%s2611_s14 + $0x2c] sm:$0xff] %v1720_v14  ;;  %v1476_v18 = vadd.f32 1.0, %v2070_v15 }
 0x5af   :  { %v2074_v19 = vpop.eup %2073  ;;  %2077 = vrcp.f32 %v1475_v16  ;;  %v1482_v20 = vadd.f32 1.0, %v2072_v17 }
 0x5b0   :  { %2079 = vrcp.f32 %v1476_v18  ;;  %v1483_v22 = vadd.f32 1.0, %v2074_v19 }
 0x5b1   :  { %2081 = vrcp.f32 %v1482_v20 }
 0x5b2   :  { %2083 = vrcp.f32 %v1483_v22 }
 0x5b3   :  { %2085 = vpow2.f32 %v1705_v21 }
 0x5b7   :  { %v2076_v23 = vpop.eup %2075 }
 0x5b8   :  { %v1479_v24 = vadd.f32 1.0, %v2076_v23 }
 0x5b9   :  { %v2078_v25 = vpop.eup %2077 }
 0x5ba   :  { %v2080_v26 = vpop.eup %2079  ;;  %2087 = vrcp.f32 %v1479_v24 }
 0x5bb   :  { %v2082_v27 = vpop.eup %2081  ;;  %v1715_v28 = vpack.c.bf16 %v2080_v26, %v2078_v25 }
 0x5bc   :  { %v2084_v29 = vpop.eup %2083 }
 0x5bd   :  { %v2086_v30 = vpop.eup %2085  ;;  %1560 = vst [vmem:[%s2611_s14 + $0x8] sm:$0xff] %v1715_v28  ;;  %v1719_v31 = vpack.c.bf16 %v2084_v29, %v2082_v27 }
 0x5be   :  { %v1486_v32 = vadd.f32 1.0, %v2086_v30 }
 0x5bf   :  { %1564 = vst [vmem:[%s2611_s14 + $0x24] sm:$0xff] %v1719_v31 }
 0x5c0   :  { %2089 = vrcp.f32 %v1486_v32 }
 0x5c4   :  { %v2088_v33 = vpop.eup %2087 }
 0x5c5   :  { %v1717_v34 = vpack.c.bf16 %v2088_v33, %v2088_v33 }
 0x5c7   :  { %1562 = vst [vmem:[%s2611_s14 + $0x18] sm:$0xf] %v1717_v34 }
 0x5ca   :  { %v2090_v35 = vpop.eup %2089 }
 0x5cb   :  { %v1721_v36 = vpack.c.bf16 %v2090_v35, %v2090_v35 }
 0x5cd   :  { %1566 = vst [vmem:[%s2611_s14 + $0x34] sm:$0xf] %v1721_v36 }

</bundles_post_ra>
